<compile_context>
chip_gen: v6e
topology: v6e:2x2x1
jax: 0.10.0
libtpu: 0.0.40
codegen_flags: <defaults>
</compile_context>

<pallas_src>
import jax
import jax.numpy as jnp
from jax.experimental import pallas as pl
from jax.experimental.pallas import tpu as pltpu


NEG_SLOPE = 0.01  # F.leaky_relu default negative_slope


# ---------------------------------------------------------------------------
# Kernel
# ---------------------------------------------------------------------------
def decoder_kernel(x_ref, w1_ref, b1_ref, w2_ref, b2_ref, o_ref):
    # Cast activations to bf16 in-kernel (cheap VPU cast, no extra HBM traffic);
    # both MXU matmuls accumulate in f32 via preferred_element_type.
    x = x_ref[...].astype(jnp.bfloat16)                               # (tm, L)
    h = jnp.dot(x, w1_ref[...], preferred_element_type=jnp.float32)   # (tm, H) f32
    h = h + b1_ref[...]                                               # (1, H) broadcast
    h = jnp.where(h > 0, h, NEG_SLOPE * h)                            # LeakyReLU in f32
    y = jnp.dot(h.astype(jnp.bfloat16), w2_ref[...],
                preferred_element_type=jnp.float32)                   # (tm, D) f32
    y = y + b2_ref[...]                                               # (1, D) broadcast
    o_ref[...] = y.astype(o_ref.dtype)                                # direct store, no pad/slice


# ---------------------------------------------------------------------------
# Parameter prep (one-time, outside the hot path)
# ---------------------------------------------------------------------------
def prepare_decoder_params(w1, b1, w2, b2, *, matmul_dtype=jnp.bfloat16):
    """Weights transposed to (in, out) layout and cast to bf16 once;
    biases kept in f32, shaped (1, N) for broadcasting.

    w1: (hidden, latent), b1: (hidden,), w2: (input_dim, hidden), b2: (input_dim,)
    """
    H, L = w1.shape
    D, H2 = w2.shape
    assert H2 == H, "layer shapes inconsistent"
    w1_t = w1.T.astype(matmul_dtype)                   # (L, H)
    w2_t = w2.T.astype(matmul_dtype)                   # (H, D)
    b1_2d = b1.reshape(1, H).astype(jnp.float32)       # (1, H)
    b2_2d = b2.reshape(1, D).astype(jnp.float32)       # (1, D)
    return w1_t, b1_2d, w2_t, b2_2d


# ---------------------------------------------------------------------------
# Tile-choice helpers
# ---------------------------------------------------------------------------
def _cores_per_chip():
    """2 TensorCores per chip on v7x, 1 on v5e/v6e.  Heuristic on device_kind."""
    try:
        kind = jax.devices()[0].device_kind.lower()
    except Exception:
        return 1
    return 2 if "7" in kind else 1


def _choose_row_tile(batch, n_cores=1, cap=512):
    """Row tile that (a) divides batch, (b) is a sublane-legal multiple of 16
    (bf16 packing; falls back to 8), (c) gives >= n_cores 'parallel' grid steps
    once the batch is big enough for megacore sharding to matter, (d) is capped
    to keep per-step VMEM small.  Falls back to one full-batch block (always a
    legal block shape) when no suitable divisor exists."""
    if batch <= 16:
        return batch
    want_steps = n_cores if (n_cores > 1 and batch >= 64) else 1
    divisors = [d for d in range(1, batch + 1) if batch % d == 0]
    for align in (16, 8):
        cands = [d for d in divisors
                 if d % align == 0 and d <= cap and batch // d >= want_steps]
        if cands:
            return max(cands)
    return batch


# ---------------------------------------------------------------------------
# Forward wrapper
# ---------------------------------------------------------------------------
def decoder_forward(x, params, *, tm=None, out_dtype=None):
    """x: (B, latent_dim).  params from prepare_decoder_params.
    out_dtype: output dtype (default: x.dtype).  bf16 halves HBM writeback."""
    w1_t, b1_2d, w2_t, b2_2d = params
    B, L = x.shape
    H = w1_t.shape[1]
    D = w2_t.shape[1]
    out_dtype = x.dtype if out_dtype is None else jnp.dtype(out_dtype)

    if tm is None:
        tm = _choose_row_tile(B, _cores_per_chip())
    if B % tm != 0 or not (tm == B or tm % 8 == 0):
        raise ValueError(f"row tile {tm} must divide batch {B} and be a "
                         f"multiple of 8 (or equal the full batch)")
    grid = (B // tm,)

    out_itemsize = jnp.dtype(out_dtype).itemsize
    # Double-buffered pipeline working set (weights/biases are small & resident).
    tile_bytes = 2 * (
        tm * L * x.dtype.itemsize
        + w1_t.size * w1_t.dtype.itemsize
        + b1_2d.size * 4
        + w2_t.size * w2_t.dtype.itemsize
        + b2_2d.size * 4
        + tm * D * out_itemsize
    )
    vmem_limit = max(32 * 1024 * 1024, int(tile_bytes * 1.5) + (1 << 20))

    flops = 2 * B * (L * H + H * D)
    bytes_accessed = int(
        x.size * x.dtype.itemsize
        + w1_t.size * w1_t.dtype.itemsize
        + w2_t.size * w2_t.dtype.itemsize
        + b1_2d.size * 4 + b2_2d.size * 4
        + B * D * out_itemsize
    )

    return pl.pallas_call(
        decoder_kernel,
        out_shape=jax.ShapeDtypeStruct((B, D), out_dtype),
        grid_spec=pltpu.PrefetchScalarGridSpec(
            num_scalar_prefetch=0,
            grid=grid,
            in_specs=[
                pl.BlockSpec((tm, L), lambda i: (i, 0)),   # x rows
                pl.BlockSpec((L, H), lambda i: (0, 0)),    # w1 (full, resident)
                pl.BlockSpec((1, H), lambda i: (0, 0)),    # b1
                pl.BlockSpec((H, D), lambda i: (0, 0)),    # w2 (full, resident)
                pl.BlockSpec((1, D), lambda i: (0, 0)),    # b2
            ],
            out_specs=pl.BlockSpec((tm, D), lambda i: (i, 0)),
        ),
        compiler_params=pltpu.CompilerParams(
            dimension_semantics=("parallel",),
            vmem_limit_bytes=vmem_limit,
        ),
        cost_estimate=pl.CostEstimate(
            flops=flops, transcendentals=0, bytes_accessed=bytes_accessed),
    )(x, w1_t, b1_2d, w2_t, b2_2d)


# ---------------------------------------------------------------------------
# References / init
# ---------------------------------------------------------------------------
def torch_linear_init(key, out_features, in_features, dtype=jnp.float32):
    """Deterministic init mirroring torch.nn.Linear default U(-1/sqrt(in), 1/sqrt(in))."""
    kw, kb = jax.random.split(key)
    bound = 1.0 / jnp.sqrt(jnp.array(in_features, dtype))
    w = jax.random.uniform(kw, (out_features, in_features), dtype, -bound, bound)
    b = jax.random.uniform(kb, (out_features,), dtype, -bound, bound)
    return w, b


def decoder_reference_f32(x, w1, b1, w2, b2):
    h = x @ w1.T + b1
    h = jnp.where(h > 0, h, NEG_SLOPE * h)
    return h @ w2.T + b2


def decoder_reference_bf16_emulated(x, w1, b1, w2, b2):
    """Mirrors the kernel's bf16-input / f32-accumulate math for a tight check."""
    xb = x.astype(jnp.bfloat16).astype(jnp.float32)
    w1b = w1.astype(jnp.bfloat16).astype(jnp.float32)
    w2b = w2.astype(jnp.bfloat16).astype(jnp.float32)
    h = xb @ w1b.T + b1
    h = jnp.where(h > 0, h, NEG_SLOPE * h)
    hb = h.astype(jnp.bfloat16).astype(jnp.float32)
    return hb @ w2b.T + b2


# ---------------------------------------------------------------------------
# Demo / correctness checks
# ---------------------------------------------------------------------------
if __name__ == "__main__":
    # Module config: Decoder(input_dim=64, hidden_dim=32, latent_dim=16)
    input_dim, hidden_dim, latent_dim = 64, 32, 16
    batch = 16

    key = jax.random.PRNGKey(0)
    k_x, k_l1, k_l2, k_x2 = jax.random.split(key, 4)

    x = jax.random.normal(k_x, (batch, latent_dim), jnp.float32)
    w1, b1 = torch_linear_init(k_l1, hidden_dim, latent_dim)   # Linear(latent -> hidden)
    w2, b2 = torch_linear_init(k_l2, input_dim, hidden_dim)    # Linear(hidden -> input)
    params = prepare_decoder_params(w1, b1, w2, b2)

    # 1) Toy batch, f32 output, single grid step (overhead-bound regime).
    out = jax.block_until_ready(decoder_forward(x, params))
    assert out.shape == (batch, input_dim) and out.dtype == jnp.float32

    # Tight check vs a reference that uses the same bf16-input quantization.
    ref_emu = decoder_reference_bf16_emulated(x, w1, b1, w2, b2)
    assert jnp.allclose(out, ref_emu, atol=1e-4, rtol=1e-4), "mismatch vs bf16-emulated reference"

    # Loose check vs the pure-f32 PyTorch-equivalent reference (bf16 matmul error budget).
    ref_f32 = decoder_reference_f32(x, w1, b1, w2, b2)
    assert jnp.allclose(out, ref_f32, atol=5e-2, rtol=5e-2), "mismatch vs f32 reference"

    # 2) Larger batch, explicit 2-step row-tiled grid (the path v7x shards over
    #    both TensorCores) with bf16 output (halved HBM writeback).
    big_batch = 256
    x2 = jax.random.normal(k_x2, (big_batch, latent_dim), jnp.float32)
    out2 = jax.block_until_ready(
        decoder_forward(x2, params, tm=128, out_dtype=jnp.bfloat16))
    assert out2.shape == (big_batch, input_dim) and out2.dtype == jnp.bfloat16
    ref2 = decoder_reference_bf16_emulated(x2, w1, b1, w2, b2)
    assert jnp.allclose(out2.astype(jnp.float32), ref2, atol=2e-2, rtol=2e-2), \
        "mismatch vs bf16-emulated reference (tiled / bf16-out path)"

    print("KERNEL_OK")
</pallas_src>

<mosaic_0001>
module attributes {stable_mosaic.version = 11 : i64} {
  func.func @decoder_kernel(%arg0: i32, %arg1: memref<16x16xf32, #tpu.memory_space<vmem>>, %arg2: memref<16x32xbf16, #tpu.memory_space<vmem>>, %arg3: memref<1x32xf32, #tpu.memory_space<vmem>>, %arg4: memref<32x64xbf16, #tpu.memory_space<vmem>>, %arg5: memref<1x64xf32, #tpu.memory_space<vmem>>, %arg6: memref<16x64xf32, #tpu.memory_space<vmem>>) attributes {dimension_semantics = [#tpu.dimension_semantics<parallel>], iteration_bounds = array<i64: 1>, scalar_prefetch = 0 : i64, scratch_operands = 0 : i64, tpu.core_type = #tpu.core_type<tc>, window_params = [{transform_indices = @transform_0, window_bounds = array<i64: 16, 16>}, {pipeline_mode = #tpu.pipeline_mode<synchronous>, transform_indices = @transform_1, window_bounds = array<i64: 16, 32>}, {pipeline_mode = #tpu.pipeline_mode<synchronous>, transform_indices = @transform_2, window_bounds = array<i64: 1, 32>}, {pipeline_mode = #tpu.pipeline_mode<synchronous>, transform_indices = @transform_3, window_bounds = array<i64: 32, 64>}, {pipeline_mode = #tpu.pipeline_mode<synchronous>, transform_indices = @transform_4, window_bounds = array<i64: 1, 64>}, {transform_indices = @transform_5, window_bounds = array<i64: 16, 64>}]} {
    %c0 = arith.constant 0 : index
    %c0_0 = arith.constant 0 : index
    %0 = vector.load %arg1[%c0, %c0_0] : memref<16x16xf32, #tpu.memory_space<vmem>>, vector<16x16xf32>
    %1 = arith.truncf %0 : vector<16x16xf32> to vector<16x16xbf16>
    %c0_1 = arith.constant 0 : index
    %c0_2 = arith.constant 0 : index
    %2 = vector.load %arg2[%c0_1, %c0_2] : memref<16x32xbf16, #tpu.memory_space<vmem>>, vector<16x32xbf16>
    %cst = arith.constant dense<0.000000e+00> : vector<16x32xf32>
    %3 = tpu.matmul %1, %2, %cst {dimension_numbers = #tpu.dot_dimension_numbers<[1], [0], [0], [1], [0, 0, 1, 1], [], []>} : vector<16x16xbf16>, vector<16x32xbf16>, vector<16x32xf32> -> vector<16x32xf32>
    %c0_3 = arith.constant 0 : index
    %c0_4 = arith.constant 0 : index
    %4 = vector.load %arg3[%c0_3, %c0_4] : memref<1x32xf32, #tpu.memory_space<vmem>>, vector<1x32xf32>
    %5 = vector.broadcast %4 : vector<1x32xf32> to vector<16x32xf32>
    %6 = arith.addf %3, %5 : vector<16x32xf32>
    %cst_5 = arith.constant 0.000000e+00 : f32
    %7 = vector.broadcast %cst_5 : f32 to vector<16x32xf32>
    %8 = arith.cmpf ogt, %6, %7 : vector<16x32xf32>
    %cst_6 = arith.constant 0.00999999977 : f32
    %9 = vector.broadcast %cst_6 : f32 to vector<16x32xf32>
    %10 = arith.mulf %9, %6 : vector<16x32xf32>
    %11 = arith.select %8, %6, %10 : vector<16x32xi1>, vector<16x32xf32>
    %12 = arith.truncf %11 : vector<16x32xf32> to vector<16x32xbf16>
    %c0_7 = arith.constant 0 : index
    %c0_8 = arith.constant 0 : index
    %13 = vector.load %arg4[%c0_7, %c0_8] : memref<32x64xbf16, #tpu.memory_space<vmem>>, vector<32x64xbf16>
    %cst_9 = arith.constant dense<0.000000e+00> : vector<16x64xf32>
    %14 = tpu.matmul %12, %13, %cst_9 {dimension_numbers = #tpu.dot_dimension_numbers<[1], [0], [0], [1], [0, 0, 1, 1], [], []>} : vector<16x32xbf16>, vector<32x64xbf16>, vector<16x64xf32> -> vector<16x64xf32>
    %c0_10 = arith.constant 0 : index
    %c0_11 = arith.constant 0 : index
    %15 = vector.load %arg5[%c0_10, %c0_11] : memref<1x64xf32, #tpu.memory_space<vmem>>, vector<1x64xf32>
    %16 = vector.broadcast %15 : vector<1x64xf32> to vector<16x64xf32>
    %17 = arith.addf %14, %16 : vector<16x64xf32>
    %c0_12 = arith.constant 0 : index
    %c0_13 = arith.constant 0 : index
    %18 = vector.load %arg6[%c0_12, %c0_13] : memref<16x64xf32, #tpu.memory_space<vmem>>, vector<16x64xf32>
    tpu.vector_store %arg6[%c0_12, %c0_13], %17 {strides = array<i32>} : memref<16x64xf32, #tpu.memory_space<vmem>>, vector<16x64xf32>,
    return
  }
  func.func @transform_0(%arg0: i32) -> (i32, i32) {
    %c0_i32 = arith.constant 0 : i32
    %c0_i32_0 = arith.constant 0 : i32
    return %arg0, %c0_i32 : i32, i32
  }
  func.func @transform_1(%arg0: i32) -> (i32, i32) {
    %c0_i32 = arith.constant 0 : i32
    %c0_i32_0 = arith.constant 0 : i32
    %c0_i32_1 = arith.constant 0 : i32
    return %c0_i32, %c0_i32_0 : i32, i32
  }
  func.func @transform_2(%arg0: i32) -> (i32, i32) {
    %c0_i32 = arith.constant 0 : i32
    %c0_i32_0 = arith.constant 0 : i32
    %c0_i32_1 = arith.constant 0 : i32
    return %c0_i32, %c0_i32_0 : i32, i32
  }
  func.func @transform_3(%arg0: i32) -> (i32, i32) {
    %c0_i32 = arith.constant 0 : i32
    %c0_i32_0 = arith.constant 0 : i32
    %c0_i32_1 = arith.constant 0 : i32
    return %c0_i32, %c0_i32_0 : i32, i32
  }
  func.func @transform_4(%arg0: i32) -> (i32, i32) {
    %c0_i32 = arith.constant 0 : i32
    %c0_i32_0 = arith.constant 0 : i32
    %c0_i32_1 = arith.constant 0 : i32
    return %c0_i32, %c0_i32_0 : i32, i32
  }
  func.func @transform_5(%arg0: i32) -> (i32, i32) {
    %c0_i32 = arith.constant 0 : i32
    %c0_i32_0 = arith.constant 0 : i32
    return %arg0, %c0_i32 : i32, i32
  }
}

</mosaic_0001>

<bundles_post_ra>
// kernel: tpu_custom_call.1
= control target key start
LH: loop header
LB: loop body
LE: loop exit
PB: predicated region body
PF: predicated region fallthrough
CT: control target
= control target key end

     0   :  { %10 = vsyncpa [#allocation3], 0  ;;  %s411_s0 = inlined_call_operand.hbm [shape: f32[16,16], index: 0, kind: input, shape index: {}]   ;;  %s412_s1 = inlined_call_operand.hbm [shape: bf16[16,32], index: 1, kind: input, shape index: {}]   ;;  %s413_s2 = inlined_call_operand.vmem [shape: f32[1,32], index: 2, kind: input, shape index: {}]   ;;  %s414_s3 = inlined_call_operand.hbm [shape: bf16[32,64], index: 3, kind: input, shape index: {}]   ;;  %s415_s4 = inlined_call_operand.vmem [shape: f32[1,64], index: 4, kind: input, shape index: {}]   ;;  %s416_s5 = inlined_call_operand.hbm [shape: f32[16,64], index: 5, kind: output, shape index: {}]  }
   0x1   :  { %11 = vsyncpa [#allocation6], 0 }
   0x2   :  { %12 = vsyncpa [#allocation4], 0  ;;  %s347_s18 = smov [#allocation5]  }
   0x3   :  { %s30_s19 = sshll.u32 %s347_s18, 4  ;;  %s31_s19 = int_to_ptr.vmem [resolvable:$true] %s30_s19 }
   0x4   :  { %s269_s20 = scalar_lea.vmem %s31_s19, 128  ;;  %p274_p1 = scmp.lt.s32.totalorder %s31_s19, %s31_s19 }
   0x5   :  { %p270_p0 = scmp.ne.s32.totalorder %s31_s19, %s269_s20  ;;  %p275_p2 = scmp.lt.s32.totalorder %s269_s20, %s269_s20 }
   0x7   :  { %p276_p3 = por %p275_p2, %p274_p1 }
   0x9   :  { %p277_p4 = pnand %p276_p3, %p270_p0 }
   0xb   :  { %280 = shalt.err (!%p277_p4)
}
   0xc   :  { %s348_s21 = smov 64   ;;  %s349_s22 = smov 4  }
   0xd   :  { %36 = dma.hbm_to_vmem [thread:$0]  %s412_s1, 128, %s31_s19, [#allocation6], %s348_s21, %s348_s21, %s349_s22  }
   0xe   :  { %s350_s25 = smov [#allocation2]  }
   0xf   :  { %s18_s26 = sshll.u32 %s350_s25, 4  ;;  %s19_s26 = int_to_ptr.vmem [resolvable:$true] %s18_s26 }
  0x10   :  { %s289_s27 = scalar_lea.vmem %s19_s26, 256  ;;  %p294_p6 = scmp.lt.s32.totalorder %s19_s26, %s19_s26 }
  0x11   :  { %p290_p5 = scmp.ne.s32.totalorder %s19_s26, %s289_s27  ;;  %p295_p7 = scmp.lt.s32.totalorder %s289_s27, %s289_s27 }
  0x13   :  { %p296_p8 = por %p295_p7, %p294_p6 }
  0x15   :  { %p297_p9 = pnand %p296_p8, %p290_p5 }
  0x17   :  { %300 = shalt.err (!%p297_p9)
}
  0x18   :  { %s351_s28 = smov 128   ;;  %s352_s29 = smov 8  }
  0x19   :  { %24 = dma.hbm_to_vmem [thread:$0]  %s411_s0, 256, %s19_s26, [#allocation3], %s351_s28, %s351_s28, %s352_s29  }
  0x1a   :  { %s353_s1 = smov [#allocation7]  }
  0x1b   :  { %s44_s7 = sshll.u32 %s353_s1, 4  ;;  %s45_s7 = int_to_ptr.vmem [resolvable:$true] %s44_s7 }
  0x1c   :  { %s309_s8 = scalar_lea.vmem %s45_s7, 256  ;;  %p314_p11 = scmp.lt.s32.totalorder %s45_s7, %s45_s7 }
  0x1d   :  { %p310_p10 = scmp.ne.s32.totalorder %s45_s7, %s309_s8  ;;  %p315_p12 = scmp.lt.s32.totalorder %s309_s8, %s309_s8 }
  0x1f   :  { %p316_p13 = por %p315_p12, %p314_p11 }
  0x21   :  { %p317_p0 = pnand %p316_p13, %p310_p10 }
  0x23   :  { %320 = shalt.err (!%p317_p0)
}
  0x24   :  { %50 = dma.hbm_to_vmem [thread:$0]  %s414_s3, 256, %s45_s7, [#allocation6], %s348_s21, %s348_s21, %s349_s22  }
  0x25   :  { %341 = dma.done.wait [#allocation3], 256  }
  0x26   :  { %342 = vsyncadd [#allocation3], 4294967040 }
  0x27   :  { %343 = dma.done.wait [#allocation6], 384  }
  0x28   :  { %344 = vsyncadd [#allocation6], 4294966912  ;;  %v354_v0 = vmov 0.0   ;;  %vm355_vm0 = vmmov 0   ;;  %v258_v1 = vld [vmem:[#allocation5] sm:$0xff]   ;;  %v63_v2 = vld [vmem:[#allocation2] sm:$0xff] }
  0x29   :  { %234 = vmatprep.subr.bf16.mxu0 %v354_v0  ;;  %236 = vmatprep.mubr.msk.bf16.mxu0 %vm355_vm0, %v354_v0  ;;  %v64_v3 = vld [vmem:[#allocation2 + $0x8] sm:$0xff]  ;;  %vm81_vm1 = vcmask 130048   ;;  %v259_v5 = vld [vmem:[#allocation7 + $0x8] sm:$0xff]   ;;  %v260_v6 = vld [vmem:[#allocation7] sm:$0xff]   ;;  %vm156_vm4 = vcmask 261120   ;;  %vm201_vm5 = vcmask 523264  }
  0x2a   :  { %240 = vmatprep.subr.bf16.mxu1 %v354_v0  ;;  %244 = vmatprep.mubr.msk.bf16.mxu1 %vm355_vm0, %v354_v0  ;;  %v65_v4 = vpack.c.bf16 %v64_v3, %v63_v2  ;;  %v222_v7 = vld [vmem:[%s413_s2] ss:$0 sm:$0xff]  ;;  %s356_s2 = smov [#allocation8]  }
  0x2b   :  { %235 = vmatpush3.bf16.msra.mxu0 %v258_v1  ;;  %241 = vmatpush3.bf16.msra.mxu1 %v259_v5  ;;  %v225_v19 = vld [vmem:[%s415_s4] ss:$0 sm:$0xff]  ;;  %s209_s13 = sshll.u32 %s356_s2, 4  ;;  %s210_s13 = int_to_ptr.vmem [resolvable:$true] %s209_s13 }
  0x2c   :  { %242 = vmatprep.subr.bf16.mxu1 %v354_v0  ;;  %s321_s14 = scalar_lea.vmem %s210_s13, 256  ;;  %p326_p2 = scmp.lt.s32.totalorder %s210_s13, %s210_s13 }
  0x2d   :  { %p322_p1 = scmp.ne.s32.totalorder %s210_s13, %s321_s14  ;;  %p327_p3 = scmp.lt.s32.totalorder %s321_s14, %s321_s14 }
  0x2e   :  { %237 = vmatmul.mubr.msk.bf16.vlgmr.msra.gmra.mxu0 %vm81_vm1, %v65_v4 }
  0x2f   :  { %243 = vmatpush3.bf16.msra.mxu1 %v260_v6  ;;  %p328_p4 = por %p327_p3, %p326_p2 }
  0x31   :  { %p329_p5 = pnand %p328_p4, %p322_p1 }
  0xee   :  { %v119_v8 = vpop.f32.mrf.mxu0 }
  0xef   :  { %v120_v9 = vadd.f32 %v222_v7, %v119_v8 }
  0xf0   :  { %v238_v10 = vpop.f32.mrf.mxu0 }
  0xf1   :  { %v128_v12 = vmul.f32 0.01, %v120_v9  ;;  %vm126_vm2 = vcmp.gt.f32.partialorder %v120_v9, 0.0 }
  0xf2   :  { %v122_v11 = vpop.f32.mrf.mxu0 }
  0xf3   :  { %v123_v13 = vadd.f32 %v222_v7, %v122_v11  ;;  %v130_v16 = vsel %vm126_vm2, %v120_v9, %v128_v12 }
  0xf4   :  { %v239_v14 = vpop.f32.mrf.mxu0 }
  0xf5   :  { %vm127_vm3 = vcmp.gt.f32.partialorder %v123_v13, 0.0  ;;  %v129_v15 = vmul.f32 0.01, %v123_v13 }
  0xf7   :  { %v131_v17 = vsel %vm127_vm3, %v123_v13, %v129_v15 }
  0xf8   :  { %v132_v18 = vpack.c.bf16 %v131_v17, %v130_v16 }
  0xfa   :  { %245 = vmatmul.mubr.msk.bf16.vlgmr.msra.gmra.mxu1 %vm156_vm4, %v132_v18 }
 0x1ba   :  { %v194_v20 = vpop.f32.mrf.mxu1 }
 0x1bb   :  { %v195_v21 = vadd.f32 %v225_v19, %v194_v20 }
 0x1bc   :  { %v246_v22 = vpop.f32.mrf.mxu1 }
 0x1bd   :  { %202 = vst.msk [vmem:[#allocation8] sm:$0xff] %vm201_vm5, %v195_v21 }
 0x1be   :  { %v197_v23 = vpop.f32.mrf.mxu1 }
 0x1bf   :  { %v198_v24 = vadd.f32 %v225_v19, %v197_v23 }
 0x1c0   :  { %v247_v25 = vpop.f32.mrf.mxu1 }
 0x1c1   :  { %203 = vst.msk [vmem:[#allocation8 + $0x8] sm:$0xff] %vm201_vm5, %v198_v24 }
 0x1c2   :  { %332 = shalt.err (!%p329_p5)
}
 0x1c3   :  { %215 = dma.vmem_to_hbm [thread:$0]  %s210_s13, 256, %s416_s5, [#allocation4], %s351_s28, %s351_s28, %s352_s29  }
 0x1c4   :  { %345 = dma.done.wait [#allocation4], 256  }
 0x1c5   :  { %346 = vsyncadd [#allocation4], 4294967040 }
 0x1c6   :  { %219 = vsyncpa [#allocation3], 1 }
 0x1c7   :  { %220 = vsyncpa [#allocation6], 1 }
 0x1c8   :  { %221 = vsyncpa [#allocation4], 1 }

</bundles_post_ra>
